<compile_context>
chip_gen: v7x
topology: tpu7x:2x2x1
jax: 0.10.0
libtpu: 0.0.40
codegen_flags: <defaults>
</compile_context>

<pallas_src>
import jax
import jax.numpy as jnp
from jax.experimental import pallas as pl
from jax.experimental.pallas import tpu as pltpu


def fcn_kernel(x_ref, w1_ref, b1_ref, w2_ref, b2_ref, w3_ref, b3_ref, o_ref):
    # Layer 1: (TB, n_states) @ (n_states, 128) + (1, 128) -> ReLU
    h1 = jnp.dot(x_ref[...], w1_ref[...], preferred_element_type=jnp.float32)
    h1 = jnp.maximum(h1 + b1_ref[...], 0.0)
    # Layer 2: (TB, 128) @ (128, 128) + (1, 128) -> ReLU
    h2 = jnp.dot(h1, w2_ref[...], preferred_element_type=jnp.float32)
    h2 = jnp.maximum(h2 + b2_ref[...], 0.0)
    # Layer 3: (TB, 128) @ (128, n_actions) + (1, n_actions)
    out = jnp.dot(h2, w3_ref[...], preferred_element_type=jnp.float32)
    o_ref[...] = (out + b3_ref[...]).astype(o_ref.dtype)


def _round_up(x, m):
    return ((x + m - 1) // m) * m


def fcn_forward(x, params, *, batch_tile=2048):
    """Fused 3-layer MLP forward. x: (B, n_states) f32 -> (B, n_actions) f32."""
    w1, b1, w2, b2, w3, b3 = params
    B, n_states = x.shape
    n_actions = w3.shape[1]

    # ---- Batch tiling (no padding: Pallas masks the ragged edge block).
    if B <= batch_tile:
        # Single tile, sublane-aligned; may overhang B (partial block).
        tb = _round_up(max(B, 8), 8)
    else:
        # Multiple tiles: force an even tile count so the "parallel" batch
        # axis shards evenly across v7x's two TensorCores.
        n_tiles = pl.cdiv(B, batch_tile)
        if n_tiles % 2 == 1:
            n_tiles += 1
        tb = _round_up(pl.cdiv(B, n_tiles), 8)
    grid = (pl.cdiv(B, tb),)

    # Constant index_map: parameters are fetched once and stay VMEM-resident.
    resident = lambda a: pl.BlockSpec(a.shape, lambda i: (0, 0))

    out = pl.pallas_call(
        fcn_kernel,
        out_shape=jax.ShapeDtypeStruct((B, n_actions), jnp.float32),
        grid=grid,
        in_specs=[
            pl.BlockSpec((tb, n_states), lambda i: (i, 0)),   # x: streamed over batch
            resident(w1), resident(b1),
            resident(w2), resident(b2),
            resident(w3), resident(b3),
        ],
        # Last dim = n_actions = full array width (legal even though <128);
        # HBM writeback is masked to the valid rows/lanes only.
        out_specs=pl.BlockSpec((tb, n_actions), lambda i: (i, 0)),
        compiler_params=pltpu.CompilerParams(
            dimension_semantics=("parallel",),                # both v7x TCs
            vmem_limit_bytes=32 * 1024 * 1024),               # headroom on v5e
    )(x, w1, b1, w2, b2, w3, b3)

    return out


def init_params(key, n_states=4, n_actions=18, hidden=128):
    """Deterministic synthetic parameter init (PyTorch-Linear-like scale)."""
    ks = jax.random.split(key, 6)

    def linear(kw, kb, fan_in, fan_out):
        bound = 1.0 / jnp.sqrt(fan_in)
        w = jax.random.uniform(kw, (fan_in, fan_out), jnp.float32, -bound, bound)
        b = jax.random.uniform(kb, (1, fan_out), jnp.float32, -bound, bound)
        return w, b

    w1, b1 = linear(ks[0], ks[1], n_states, hidden)
    w2, b2 = linear(ks[2], ks[3], hidden, hidden)
    w3, b3 = linear(ks[4], ks[5], hidden, n_actions)
    return (w1, b1, w2, b2, w3, b3)


def fcn_reference(x, params):
    w1, b1, w2, b2, w3, b3 = params
    h1 = jnp.maximum(x @ w1 + b1, 0.0)
    h2 = jnp.maximum(h1 @ w2 + b2, 0.0)
    return h2 @ w3 + b3


if __name__ == "__main__":
    key = jax.random.PRNGKey(0)
    k_params, k_x1, k_x2, k_x3 = jax.random.split(key, 4)

    n_states, n_actions = 4, 18
    params = init_params(k_params, n_states=n_states, n_actions=n_actions)

    # Small aligned batch (single tile, exact sublane multiple).
    x_small = jax.random.normal(k_x1, (8, n_states), jnp.float32)
    out_small = jax.block_until_ready(fcn_forward(x_small, params))
    ref_small = fcn_reference(x_small, params)
    assert out_small.shape == (8, n_actions)
    assert jnp.allclose(out_small, ref_small, atol=1e-5, rtol=1e-5), \
        "small-batch mismatch vs JAX reference"

    # Tiny ragged batch (< 8 rows): single partial block, masked writeback.
    x_tiny = jax.random.normal(k_x3, (2, n_states), jnp.float32)
    out_tiny = jax.block_until_ready(fcn_forward(x_tiny, params))
    ref_tiny = fcn_reference(x_tiny, params)
    assert out_tiny.shape == (2, n_actions)
    assert jnp.allclose(out_tiny, ref_tiny, atol=1e-5, rtol=1e-5), \
        "tiny-batch mismatch vs JAX reference"

    # Larger ragged batch with a small batch_tile to exercise the multi-tile
    # grid, even tile count, and ragged edge block (no wrapper-side padding).
    x_big = jax.random.normal(k_x2, (1030, n_states), jnp.float32)
    out_big = jax.block_until_ready(fcn_forward(x_big, params, batch_tile=256))
    ref_big = fcn_reference(x_big, params)
    assert out_big.shape == (1030, n_actions)
    assert jnp.allclose(out_big, ref_big, atol=1e-5, rtol=1e-5), \
        "large-batch mismatch vs JAX reference"

    print("KERNEL_OK")
</pallas_src>

<mosaic_0001>
module attributes {stable_mosaic.version = 11 : i64} {
  func.func @fcn_kernel(%arg0: i32, %arg1: memref<8x4xf32, #tpu.memory_space<vmem>>, %arg2: memref<4x128xf32, #tpu.memory_space<vmem>>, %arg3: memref<1x128xf32, #tpu.memory_space<vmem>>, %arg4: memref<128x128xf32, #tpu.memory_space<vmem>>, %arg5: memref<1x128xf32, #tpu.memory_space<vmem>>, %arg6: memref<128x18xf32, #tpu.memory_space<vmem>>, %arg7: memref<1x18xf32, #tpu.memory_space<vmem>>, %arg8: memref<8x18xf32, #tpu.memory_space<vmem>>) attributes {dimension_semantics = [#tpu.dimension_semantics<parallel>], iteration_bounds = array<i64: 1>, scalar_prefetch = 0 : i64, scratch_operands = 0 : i64, tpu.core_type = #tpu.core_type<tc>, window_params = [{transform_indices = @transform_0, window_bounds = array<i64: 8, 4>}, {pipeline_mode = #tpu.pipeline_mode<synchronous>, transform_indices = @transform_1, window_bounds = array<i64: 4, 128>}, {pipeline_mode = #tpu.pipeline_mode<synchronous>, transform_indices = @transform_2, window_bounds = array<i64: 1, 128>}, {pipeline_mode = #tpu.pipeline_mode<synchronous>, transform_indices = @transform_3, window_bounds = array<i64: 128, 128>}, {pipeline_mode = #tpu.pipeline_mode<synchronous>, transform_indices = @transform_4, window_bounds = array<i64: 1, 128>}, {pipeline_mode = #tpu.pipeline_mode<synchronous>, transform_indices = @transform_5, window_bounds = array<i64: 128, 18>}, {pipeline_mode = #tpu.pipeline_mode<synchronous>, transform_indices = @transform_6, window_bounds = array<i64: 1, 18>}, {transform_indices = @transform_7, window_bounds = array<i64: 8, 18>}]} {
    %c0 = arith.constant 0 : index
    %c0_0 = arith.constant 0 : index
    %0 = vector.load %arg1[%c0, %c0_0] : memref<8x4xf32, #tpu.memory_space<vmem>>, vector<8x4xf32>
    %c0_1 = arith.constant 0 : index
    %c0_2 = arith.constant 0 : index
    %1 = vector.load %arg2[%c0_1, %c0_2] : memref<4x128xf32, #tpu.memory_space<vmem>>, vector<4x128xf32>
    %cst = arith.constant dense<0.000000e+00> : vector<8x128xf32>
    %2 = tpu.matmul %0, %1, %cst {dimension_numbers = #tpu.dot_dimension_numbers<[1], [0], [0], [1], [0, 0, 1, 1], [], []>} : vector<8x4xf32>, vector<4x128xf32>, vector<8x128xf32> -> vector<8x128xf32>
    %c0_3 = arith.constant 0 : index
    %c0_4 = arith.constant 0 : index
    %3 = vector.load %arg3[%c0_3, %c0_4] : memref<1x128xf32, #tpu.memory_space<vmem>>, vector<1x128xf32>
    %4 = vector.broadcast %3 : vector<1x128xf32> to vector<8x128xf32>
    %5 = arith.addf %2, %4 : vector<8x128xf32>
    %cst_5 = arith.constant 0.000000e+00 : f32
    %6 = vector.broadcast %cst_5 : f32 to vector<8x128xf32>
    %7 = arith.maximumf %5, %6 : vector<8x128xf32>
    %c0_6 = arith.constant 0 : index
    %c0_7 = arith.constant 0 : index
    %8 = vector.load %arg4[%c0_6, %c0_7] : memref<128x128xf32, #tpu.memory_space<vmem>>, vector<128x128xf32>
    %cst_8 = arith.constant dense<0.000000e+00> : vector<8x128xf32>
    %9 = tpu.matmul %7, %8, %cst_8 {dimension_numbers = #tpu.dot_dimension_numbers<[1], [0], [0], [1], [0, 0, 1, 1], [], []>} : vector<8x128xf32>, vector<128x128xf32>, vector<8x128xf32> -> vector<8x128xf32>
    %c0_9 = arith.constant 0 : index
    %c0_10 = arith.constant 0 : index
    %10 = vector.load %arg5[%c0_9, %c0_10] : memref<1x128xf32, #tpu.memory_space<vmem>>, vector<1x128xf32>
    %11 = vector.broadcast %10 : vector<1x128xf32> to vector<8x128xf32>
    %12 = arith.addf %9, %11 : vector<8x128xf32>
    %cst_11 = arith.constant 0.000000e+00 : f32
    %13 = vector.broadcast %cst_11 : f32 to vector<8x128xf32>
    %14 = arith.maximumf %12, %13 : vector<8x128xf32>
    %c0_12 = arith.constant 0 : index
    %c0_13 = arith.constant 0 : index
    %15 = vector.load %arg6[%c0_12, %c0_13] : memref<128x18xf32, #tpu.memory_space<vmem>>, vector<128x18xf32>
    %cst_14 = arith.constant dense<0.000000e+00> : vector<8x18xf32>
    %16 = tpu.matmul %14, %15, %cst_14 {dimension_numbers = #tpu.dot_dimension_numbers<[1], [0], [0], [1], [0, 0, 1, 1], [], []>} : vector<8x128xf32>, vector<128x18xf32>, vector<8x18xf32> -> vector<8x18xf32>
    %c0_15 = arith.constant 0 : index
    %c0_16 = arith.constant 0 : index
    %17 = vector.load %arg7[%c0_15, %c0_16] : memref<1x18xf32, #tpu.memory_space<vmem>>, vector<1x18xf32>
    %18 = vector.broadcast %17 : vector<1x18xf32> to vector<8x18xf32>
    %19 = arith.addf %16, %18 : vector<8x18xf32>
    %c0_17 = arith.constant 0 : index
    %c0_18 = arith.constant 0 : index
    %20 = vector.load %arg8[%c0_17, %c0_18] : memref<8x18xf32, #tpu.memory_space<vmem>>, vector<8x18xf32>
    tpu.vector_store %arg8[%c0_17, %c0_18], %19 {strides = array<i32>} : memref<8x18xf32, #tpu.memory_space<vmem>>, vector<8x18xf32>,
    return
  }
  func.func @transform_0(%arg0: i32) -> (i32, i32) {
    %c0_i32 = arith.constant 0 : i32
    %c0_i32_0 = arith.constant 0 : i32
    return %arg0, %c0_i32 : i32, i32
  }
  func.func @transform_1(%arg0: i32) -> (i32, i32) {
    %c0_i32 = arith.constant 0 : i32
    %c0_i32_0 = arith.constant 0 : i32
    %c0_i32_1 = arith.constant 0 : i32
    return %c0_i32, %c0_i32_0 : i32, i32
  }
  func.func @transform_2(%arg0: i32) -> (i32, i32) {
    %c0_i32 = arith.constant 0 : i32
    %c0_i32_0 = arith.constant 0 : i32
    %c0_i32_1 = arith.constant 0 : i32
    return %c0_i32, %c0_i32_0 : i32, i32
  }
  func.func @transform_3(%arg0: i32) -> (i32, i32) {
    %c0_i32 = arith.constant 0 : i32
    %c0_i32_0 = arith.constant 0 : i32
    %c0_i32_1 = arith.constant 0 : i32
    return %c0_i32, %c0_i32_0 : i32, i32
  }
  func.func @transform_4(%arg0: i32) -> (i32, i32) {
    %c0_i32 = arith.constant 0 : i32
    %c0_i32_0 = arith.constant 0 : i32
    %c0_i32_1 = arith.constant 0 : i32
    return %c0_i32, %c0_i32_0 : i32, i32
  }
  func.func @transform_5(%arg0: i32) -> (i32, i32) {
    %c0_i32 = arith.constant 0 : i32
    %c0_i32_0 = arith.constant 0 : i32
    %c0_i32_1 = arith.constant 0 : i32
    return %c0_i32, %c0_i32_0 : i32, i32
  }
  func.func @transform_6(%arg0: i32) -> (i32, i32) {
    %c0_i32 = arith.constant 0 : i32
    %c0_i32_0 = arith.constant 0 : i32
    %c0_i32_1 = arith.constant 0 : i32
    return %c0_i32, %c0_i32_0 : i32, i32
  }
  func.func @transform_7(%arg0: i32) -> (i32, i32) {
    %c0_i32 = arith.constant 0 : i32
    %c0_i32_0 = arith.constant 0 : i32
    return %arg0, %c0_i32 : i32, i32
  }
}

</mosaic_0001>

<bundles_post_ra>
// kernel: tpu_custom_call.1
= control target key start
LH: loop header
LB: loop body
LE: loop exit
PB: predicated region body
PF: predicated region fallthrough
CT: control target
= control target key end

     0   :  { %vm40_vm0 = vcmask 1043456   ;;  %v510_v2 = vmov 0.0   ;;  %vm511_vm1 = vmmov 0   ;;  %vm36_vm2 = vcmask 31744   ;;  %s696_s0 = inlined_call_operand.vmem [shape: f32[8,4], index: 0, kind: input, shape index: {}]   ;;  %s697_s1 = inlined_call_operand.vmem [shape: f32[4,128], index: 1, kind: input, shape index: {}]   ;;  %s698_s2 = inlined_call_operand.vmem [shape: f32[1,128], index: 2, kind: input, shape index: {}]   ;;  %s699_s3 = inlined_call_operand.vmem [shape: f32[128,128], index: 3, kind: input, shape index: {}]   ;;  %s700_s4 = inlined_call_operand.vmem [shape: f32[1,128], index: 4, kind: input, shape index: {}]   ;;  %s701_s5 = inlined_call_operand.vmem [shape: f32[128,18], index: 5, kind: input, shape index: {}]   ;;  %s702_s6 = inlined_call_operand.vmem [shape: f32[1,18], index: 6, kind: input, shape index: {}]   ;;  %s703_s7 = inlined_call_operand.hbm [shape: f32[8,18], index: 7, kind: output, shape index: {}]  }
   0x1   :  { %v28_v0 = vld [vmem:[%s697_s1] sm:$0xf]  ;;  %359 = vmatprep.subr.mxu0 %v510_v2  ;;  %361 = vmatprep.mubr.msk.f32.mxu0 %vm511_vm1, %v510_v2  ;;  %v116_v4 = vld [vmem:[%s699_s3 + $0x8] sm:$0xff]  ;;  %v117_v5 = vld [vmem:[%s699_s3 + $0x10] sm:$0xff]  ;;  %v512_v6 = vmov 0.0|0.0  }
   0x2   :  { %v27_v1 = vld [vmem:[%s696_s0] sm:$0xff]  ;;  %360 = vmatpush3.msk.msra.mxu0 %vm40_vm0, %v28_v0  ;;  %434 = vmatprep.subr.bf16.mxu1 %v512_v6  ;;  %v118_v8 = vld [vmem:[%s699_s3 + $0x18] sm:$0xff]  ;;  %v120_v11 = vld [vmem:[%s699_s3 + $0x28] sm:$0xff] }
   0x3   :  { %v115_v3 = vld [vmem:[%s699_s3] sm:$0xff]  ;;  %362 = vmatmul.mubr.msk.f32.vlgmr.msra.gmra.mrb[0].mxu0 %vm36_vm2, %v27_v1  ;;  %396 = vmatprep.mubr.msk.f32.mxu1 %vm511_vm1, %v510_v2  ;;  %v438_v9 = vpack.c.bf16 %v118_v8, %v117_v5 }
   0x4   :  { %v435_v7 = vpack.c.bf16 %v116_v4, %v115_v3  ;;  %458 = vmatprep.subr.bf16.mxu0 %v512_v6  ;;  %v119_v10 = vld [vmem:[%s699_s3 + $0x20] sm:$0xff]  ;;  %431 = vmatprep.mubr.msk.f32.mxu0 %vm511_vm1, %v510_v2 }
   0x6   :  { %436 = vmatpush3.bf16.msra.mxu1 %v435_v7 }
   0x7   :  { %437 = vmatprep.subr.bf16.mxu1 %v512_v6 }
   0x8   :  { %12 = vsyncpa [#allocation3], 0  ;;  %v441_v12 = vpack.c.bf16 %v120_v11, %v119_v10  ;;  %v121_v13 = vld [vmem:[%s699_s3 + $0x30] sm:$0xff]  ;;  %v122_v14 = vld [vmem:[%s699_s3 + $0x38] sm:$0xff]  ;;  %s513_s20 = smov [#allocation2]   ;;  %vm302_vm3 = vcmask 146432  }
   0x9   :  { %v444_v15 = vpack.c.bf16 %v122_v14, %v121_v13  ;;  %v123_v16 = vld [vmem:[%s699_s3 + $0x40] sm:$0xff]  ;;  %v124_v17 = vld [vmem:[%s699_s3 + $0x48] sm:$0xff]  ;;  %v125_v19 = vld [vmem:[%s699_s3 + $0x50] sm:$0xff]  ;;  %s310_s21 = sshll.u32 %s513_s20, 4  ;;  %s311_s21 = int_to_ptr.vmem [resolvable:$true] %s310_s21 }
   0xa   :  { %439 = vmatpush3.bf16.msra.mxu1 %v438_v9  ;;  %v447_v18 = vpack.c.bf16 %v124_v17, %v123_v16  ;;  %v126_v20 = vld [vmem:[%s699_s3 + $0x58] sm:$0xff]  ;;  %v127_v22 = vld [vmem:[%s699_s3 + $0x60] sm:$0xff]  ;;  %v128_v23 = vld [vmem:[%s699_s3 + $0x68] sm:$0xff]  ;;  %p491_p1 = scmp.lt.s32.totalorder %s311_s21, %s311_s21 }
   0xb   :  { %440 = vmatprep.subr.bf16.mxu1 %v512_v6  ;;  %v450_v21 = vpack.c.bf16 %v126_v20, %v125_v19  ;;  %v453_v24 = vpack.c.bf16 %v128_v23, %v127_v22  ;;  %v129_v25 = vld [vmem:[%s699_s3 + $0x70] sm:$0xff]  ;;  %v130_v26 = vld [vmem:[%s699_s3 + $0x78] sm:$0xff]  ;;  %v209_v28 = vld [vmem:[%s701_s5] sm:$0xff] }
   0xc   :  { %v456_v27 = vpack.c.bf16 %v130_v26, %v129_v25  ;;  %v210_v29 = vld [vmem:[%s701_s5 + $0x8] sm:$0xff]  ;;  %v211_v30 = vld [vmem:[%s701_s5 + $0x10] sm:$0xff]  ;;  %v212_v32 = vld [vmem:[%s701_s5 + $0x18] sm:$0xff] }
   0xd   :  { %v459_v31 = vpack.c.bf16 %v210_v29, %v209_v28  ;;  %v462_v33 = vpack.c.bf16 %v212_v32, %v211_v30  ;;  %v213_v34 = vld [vmem:[%s701_s5 + $0x20] sm:$0xff]  ;;  %v214_v35 = vld [vmem:[%s701_s5 + $0x28] sm:$0xff]  ;;  %v215_v37 = vld [vmem:[%s701_s5 + $0x30] sm:$0xff] }
   0xe   :  { %442 = vmatpush3.bf16.msra.mxu1 %v441_v12  ;;  %v465_v36 = vpack.c.bf16 %v214_v35, %v213_v34  ;;  %v216_v38 = vld [vmem:[%s701_s5 + $0x38] sm:$0xff]  ;;  %v217_v40 = vld [vmem:[%s701_s5 + $0x40] sm:$0xff]  ;;  %v218_v41 = vld [vmem:[%s701_s5 + $0x48] sm:$0xff] }
   0xf   :  { %443 = vmatprep.subr.bf16.mxu1 %v512_v6  ;;  %460 = vmatpush3.bf16.msra.mxu0 %v459_v31  ;;  %v468_v39 = vpack.c.bf16 %v216_v38, %v215_v37  ;;  %v471_v42 = vpack.c.bf16 %v218_v41, %v217_v40  ;;  %v219_v43 = vld [vmem:[%s701_s5 + $0x50] sm:$0xff]  ;;  %v220_v44 = vld [vmem:[%s701_s5 + $0x58] sm:$0xff]  ;;  %v221_v46 = vld [vmem:[%s701_s5 + $0x60] sm:$0xff] }
  0x10   :  { %461 = vmatprep.subr.bf16.mxu0 %v512_v6  ;;  %v474_v45 = vpack.c.bf16 %v220_v44, %v219_v43  ;;  %v222_v47 = vld [vmem:[%s701_s5 + $0x68] sm:$0xff]  ;;  %v318_v49 = vld [vmem:[%s698_s2] ss:$0 sm:$0xff]  ;;  %v223_v54 = vld [vmem:[%s701_s5 + $0x70] sm:$0xff] }
  0x11   :  { %v477_v48 = vpack.c.bf16 %v222_v47, %v221_v46  ;;  %v224_v55 = vld [vmem:[%s701_s5 + $0x78] sm:$0xff]  ;;  %v321_v57 = vld [vmem:[%s700_s4] ss:$0 sm:$0xff]  ;;  %s486_s5 = scalar_lea.vmem %s311_s21, 128 }
  0x12   :  { %445 = vmatpush3.bf16.msra.mxu1 %v444_v15  ;;  %v480_v56 = vpack.c.bf16 %v224_v55, %v223_v54  ;;  %v322_v62 = vld [vmem:[%s702_s6] ss:$0 sm:$0xff]  ;;  %p487_p0 = scmp.ne.s32.totalorder %s311_s21, %s486_s5  ;;  %p492_p2 = scmp.lt.s32.totalorder %s486_s5, %s486_s5 }
  0x13   :  { %446 = vmatprep.subr.bf16.mxu1 %v512_v6  ;;  %463 = vmatpush3.bf16.msra.mxu0 %v462_v33 }
  0x14   :  { %464 = vmatprep.subr.bf16.mxu0 %v512_v6  ;;  %p493_p3 = por %p492_p2, %p491_p1 }
  0x16   :  { %448 = vmatpush3.bf16.msra.mxu1 %v447_v18  ;;  %p494_p4 = pnand %p493_p3, %p487_p0 }
  0x17   :  { %449 = vmatprep.subr.bf16.mxu1 %v512_v6  ;;  %466 = vmatpush3.bf16.msra.mxu0 %v465_v36 }
  0x18   :  { %467 = vmatprep.subr.bf16.mxu0 %v512_v6 }
  0x1a   :  { %451 = vmatpush3.bf16.msra.mxu1 %v450_v21 }
  0x1b   :  { %452 = vmatprep.subr.bf16.mxu1 %v512_v6  ;;  %469 = vmatpush3.bf16.msra.mxu0 %v468_v39 }
  0x1c   :  { %470 = vmatprep.subr.bf16.mxu0 %v512_v6 }
  0x1e   :  { %454 = vmatpush3.bf16.msra.mxu1 %v453_v24 }
  0x1f   :  { %455 = vmatprep.subr.bf16.mxu1 %v512_v6  ;;  %472 = vmatpush3.bf16.msra.mxu0 %v471_v42 }
  0x20   :  { %473 = vmatprep.subr.bf16.mxu0 %v512_v6 }
  0x22   :  { %457 = vmatpush3.bf16.msra.mxu1 %v456_v27 }
  0x23   :  { %475 = vmatpush3.bf16.msra.mxu0 %v474_v45 }
  0x24   :  { %476 = vmatprep.subr.bf16.mxu0 %v512_v6 }
  0x27   :  { %478 = vmatpush3.bf16.msra.mxu0 %v477_v48 }
  0x28   :  { %479 = vmatprep.subr.bf16.mxu0 %v512_v6 }
  0x2b   :  { %481 = vmatpush3.bf16.msra.mxu0 %v480_v56 }
  0xd6   :  { %v110_v50 = vpop.f32.mrb[0].mxu0 }
  0xd7   :  { %v111_v51 = vadd.f32 %v318_v49, %v110_v50  ;;  %v363_v52 = vpop.f32.mrb[1].mxu0 }
  0xd9   :  { %v114_v53 = vmax.f32 %v111_v51, 0.0 }
  0xdb   :  { %397 = vmatmul.mubr.f32.vlgmr.msra.gmra.mrb[0].mxu1 %v114_v53 }
 0x1ae   :  { %v204_v58 = vpop.f32.mrb[0].mxu1 }
 0x1af   :  { %v205_v59 = vadd.f32 %v321_v57, %v204_v58  ;;  %v398_v60 = vpop.f32.mrb[1].mxu1 }
 0x1b1   :  { %v208_v61 = vmax.f32 %v205_v59, 0.0 }
 0x1b3   :  { %432 = vmatmul.mubr.f32.vlgmr.msra.gmra.mrb[2].mxu0 %v208_v61 }
 0x286   :  { %v298_v63 = vpop.f32.mrb[2].mxu0 }
 0x287   :  { %v299_v0 = vadd.f32 %v322_v62, %v298_v63  ;;  %v433_v1 = vpop.f32.mrb[3].mxu0 }
 0x289   :  { %303 = vst.msk [vmem:[#allocation2] sm:$0xff] %vm302_vm3, %v299_v0 }
 0x28a   :  { %497 = shalt.err (!%p494_p4)
}
 0x28b   :  { %s498_s23 = scalar_lea.hbm %s703_s7, 128 }
 0x28c   :  { %p499_p5 = scmp.ne.s32.totalorder %s703_s7, %s498_s23  ;;  %p502_p6 = scmp.lt.u32.totalorder %s498_s23, %s703_s7 }
 0x28e   :  { %p504_p7 = pnand %p502_p6, %p499_p5 }
 0x290   :  { %507 = shalt.err (!%p504_p7)
}
 0x291   :  { %313 = dma.vmem_to_hbm [thread:$0]  %s311_s21, 128, %s703_s7, [#allocation3]  }
 0x292   :  { %508 = dma.done.wait [#allocation3], 128  }
 0x293   :  { %509 = vsyncadd [#allocation3], 4294967168 }
 0x294   :  { %317 = vsyncpa [#allocation3], 1 }

</bundles_post_ra>
